<compile_context>
chip_gen: v5e
topology: v5e:2x2
jax: 0.10.0
libtpu: 0.0.40
codegen_flags: <defaults>
</compile_context>

<pallas_src>
import functools

import jax
import jax.numpy as jnp
from jax.experimental import pallas as pl
from jax.experimental.pallas import tpu as pltpu

_LANE = 128


def _round_up(x, m):
    return (x + m - 1) // m * m


def _pick_row_tile(Ho, Wo):
    # largest divisor of Ho keeping ~<=1024 output rows per tile (lane-dense f32 tile
    # of (TR*Wo, 128) stays ~512 KiB; fits comfortably in 64 MiB VMEM on v7x too).
    best = 1
    for tr in range(1, Ho + 1):
        if Ho % tr == 0 and tr * Wo <= 1024:
            best = tr
    return best


# ---------------------------------------------------------------------------
# Kernels
# ---------------------------------------------------------------------------
def _maxpool_kernel(H, W, C, x_ref, o_ref):
    # x_ref block: (1, H, W//2, 2C)  (channel-interleaved column pairs, free reshape)
    H2, W2 = H // 2, W // 2
    v = x_ref[0]                                   # (H, W2, 2C)
    v = v.reshape(H2, 2, W2, 2 * C)                # split leading (row) dim only
    v = jnp.maximum(v[:, 0], v[:, 1])              # max over row pairs  -> (H2, W2, 2C)
    o_ref[0] = jnp.maximum(v[:, :, :C], v[:, :, C:])   # max over col pairs -> (H2, W2, C)


def _conv_stats_kernel(TR, Wo, Cin, Cpad, xpad_ref, w_ref, y_ref, stats_ref):
    # xpad_ref: (1, Ho+2, Wo+2, Cin) resident per image (block idx constant over t)
    # w_ref:    (3, 3, Cin, Cpad)    resident
    # y_ref:    (1, TR, Wo, Cpad)    raw conv output tile (lane-dense)
    # stats_ref:(1, 2, Cpad)         per-image [sum; sum_sq] accumulator across t
    t = pl.program_id(1)
    base = pl.multiple_of(t * TR, TR)

    acc = jnp.zeros((TR * Wo, Cpad), jnp.float32)
    for dy in range(3):
        rows = xpad_ref[0, pl.ds(base + dy, TR), :, :]          # (TR, Wo+2, Cin)
        for dx in range(3):
            xs = rows[:, dx:dx + Wo, :].reshape(TR * Wo, Cin)   # shifted tap
            acc = acc + jnp.dot(xs, w_ref[dy, dx],
                                preferred_element_type=jnp.float32)

    y_ref[0] = acc.reshape(TR, Wo, Cpad)

    s = jnp.sum(acc, axis=0, keepdims=True)                     # (1, Cpad)
    ss = jnp.sum(acc * acc, axis=0, keepdims=True)              # (1, Cpad)
    part = jnp.concatenate([s, ss], axis=0)                     # (2, Cpad)

    @pl.when(t == 0)
    def _():
        stats_ref[0] = part

    @pl.when(t > 0)
    def _():
        stats_ref[0] = stats_ref[0] + part


def _bn_relu_kernel(y_ref, scale_ref, shift_ref, o_ref):
    # y = max(y * scale + shift, 0);  scale/shift fold gamma, beta, mean, rsqrt(var+eps)
    o_ref[...] = jnp.maximum(y_ref[...] * scale_ref[...] + shift_ref[...], 0.0)


# ---------------------------------------------------------------------------
# Wrappers
# ---------------------------------------------------------------------------
def maxpool2x2(x_nhwc):
    N, H, W, C = x_nhwc.shape
    H2, W2 = H // 2, W // 2
    xr = x_nhwc.reshape(N, H, W2, 2 * C)           # free row-major reshape, no copy
    kern = functools.partial(_maxpool_kernel, H, W, C)
    return pl.pallas_call(
        kern,
        out_shape=jax.ShapeDtypeStruct((N, H2, W2, C), x_nhwc.dtype),
        grid=(N,),
        in_specs=[pl.BlockSpec((1, H, W2, 2 * C), lambda n: (n, 0, 0, 0))],
        out_specs=pl.BlockSpec((1, H2, W2, C), lambda n: (n, 0, 0, 0)),
        compiler_params=pltpu.CompilerParams(
            dimension_semantics=("parallel",)),
    )(xr)


def conv_bn_relu(x_nhwc, w_hwio, gamma, beta):
    """Conv3x3(pad=1, no bias) -> train-mode BN -> ReLU.

    Returns activation with channels padded to a multiple of 128 (lane-dense);
    caller slices once at the end. Conv bias is intentionally dropped: bias
    followed by training-mode BatchNorm cancels exactly.
    """
    N, Ho, Wo, Cin = x_nhwc.shape
    kin, kout = w_hwio.shape[2], w_hwio.shape[3]
    Cpad = _round_up(kout, _LANE)

    # Zero-pad weights: in-channels up to the (possibly already padded) activation
    # channels, out-channels up to lane-dense Cpad.  BN affine params likewise
    # (zeros => padded channels stay exactly 0 after BN+ReLU).
    w_p = jnp.pad(w_hwio, ((0, 0), (0, 0), (0, Cin - kin), (0, Cpad - kout)))
    gamma_p = jnp.pad(gamma, (0, Cpad - kout))
    beta_p = jnp.pad(beta, (0, Cpad - kout))

    xpad = jnp.pad(x_nhwc, ((0, 0), (1, 1), (1, 1), (0, 0)))    # single 1x pad

    TR = _pick_row_tile(Ho, Wo)
    grid = (N, Ho // TR)

    kern = functools.partial(_conv_stats_kernel, TR, Wo, Cin, Cpad)
    flops = 2 * N * Ho * Wo * 9 * Cin * Cpad
    bytes_accessed = 4 * (xpad.size + w_p.size + N * Ho * Wo * Cpad + N * 2 * Cpad)

    # Pass 1: conv (9 shifted MXU dots) + per-image channel sum / sum-of-squares.
    y, stats = pl.pallas_call(
        kern,
        out_shape=(jax.ShapeDtypeStruct((N, Ho, Wo, Cpad), jnp.float32),
                   jax.ShapeDtypeStruct((N, 2, Cpad), jnp.float32)),
        grid=grid,
        in_specs=[
            # whole padded image resident while its row tiles are processed
            pl.BlockSpec((1, Ho + 2, Wo + 2, Cin), lambda n, t: (n, 0, 0, 0)),
            pl.BlockSpec((3, 3, Cin, Cpad), lambda n, t: (0, 0, 0, 0)),
        ],
        out_specs=(
            pl.BlockSpec((1, TR, Wo, Cpad), lambda n, t: (n, t, 0, 0)),
            pl.BlockSpec((1, 2, Cpad), lambda n, t: (n, 0, 0)),
        ),
        compiler_params=pltpu.CompilerParams(
            dimension_semantics=("parallel", "arbitrary"),
            vmem_limit_bytes=32 * 1024 * 1024,   # conservative; retune per generation
        ),
        cost_estimate=pl.CostEstimate(flops=flops, transcendentals=0,
                                      bytes_accessed=bytes_accessed),
    )(xpad, w_p)

    # Finalize BatchNorm statistics (O(C) glue): biased variance, eps=1e-5.
    m = N * Ho * Wo
    tot = jnp.sum(stats, axis=0)                                # (2, Cpad)
    mean = tot[0] / m
    var = jnp.maximum(tot[1] / m - mean * mean, 0.0)
    scale = gamma_p * jax.lax.rsqrt(var + 1e-5)
    shift = beta_p - mean * scale

    # Pass 2: cheap lane-dense elementwise BN-apply + ReLU.
    a = pl.pallas_call(
        _bn_relu_kernel,
        out_shape=jax.ShapeDtypeStruct((N, Ho, Wo, Cpad), jnp.float32),
        grid=grid,
        in_specs=[
            pl.BlockSpec((1, TR, Wo, Cpad), lambda n, t: (n, t, 0, 0)),
            pl.BlockSpec((1, 1, 1, Cpad), lambda n, t: (0, 0, 0, 0)),
            pl.BlockSpec((1, 1, 1, Cpad), lambda n, t: (0, 0, 0, 0)),
        ],
        out_specs=pl.BlockSpec((1, TR, Wo, Cpad), lambda n, t: (n, t, 0, 0)),
        compiler_params=pltpu.CompilerParams(
            dimension_semantics=("parallel", "parallel"),
            vmem_limit_bytes=32 * 1024 * 1024,
        ),
    )(y, scale.reshape(1, 1, 1, Cpad), shift.reshape(1, 1, 1, Cpad))
    return a


def down_forward(x_nchw, params):
    """Equivalent of down(in_ch, out_ch).forward(x), x in NCHW (training-mode BN)."""
    x = jnp.transpose(x_nchw, (0, 2, 3, 1))                     # -> NHWC
    x = maxpool2x2(x)
    # conv biases (b1/b2) are mathematically redundant under training-mode BN.
    a1 = conv_bn_relu(x, params["w1"], params["g1"], params["be1"])
    a2 = conv_bn_relu(a1, params["w2"], params["g2"], params["be2"])
    out_ch = params["w2"].shape[-1]
    y = a2[..., :out_ch]                                        # drop lane padding
    return jnp.transpose(y, (0, 3, 1, 2))                       # -> NCHW


# ---------------------------------------------------------------------------
# Pure-JAX reference (sanity check only)
# ---------------------------------------------------------------------------
def _ref_down(x_nchw, params):
    x = jnp.transpose(x_nchw, (0, 2, 3, 1))
    x = jax.lax.reduce_window(x, -jnp.inf, jax.lax.max,
                              (1, 2, 2, 1), (1, 2, 2, 1), "VALID")

    def cbr(x, w, b, g, be):
        y = jax.lax.conv_general_dilated(
            x, w, (1, 1), "SAME",
            dimension_numbers=("NHWC", "HWIO", "NHWC")) + b
        mu = jnp.mean(y, axis=(0, 1, 2), keepdims=True)
        var = jnp.mean((y - mu) ** 2, axis=(0, 1, 2), keepdims=True)
        return jnp.maximum((y - mu) * jax.lax.rsqrt(var + 1e-5) * g + be, 0.0)

    x = cbr(x, params["w1"], params["b1"], params["g1"], params["be1"])
    x = cbr(x, params["w2"], params["b2"], params["g2"], params["be2"])
    return jnp.transpose(x, (0, 3, 1, 2))


# ---------------------------------------------------------------------------
# Main
# ---------------------------------------------------------------------------
if __name__ == "__main__":
    N, in_ch, H, W = 2, 4, 16, 16
    out_ch = 8

    key = jax.random.PRNGKey(0)
    kx, kw1, kb1, kw2, kb2 = jax.random.split(key, 5)

    x = jax.random.normal(kx, (N, in_ch, H, W), dtype=jnp.float32)

    params = {
        # conv weights kept in HWIO layout (3, 3, Cin, Cout)
        "w1": jax.random.normal(kw1, (3, 3, in_ch, out_ch), jnp.float32) * 0.1,
        "b1": jax.random.normal(kb1, (out_ch,), jnp.float32) * 0.1,
        "g1": jnp.ones((out_ch,), jnp.float32),
        "be1": jnp.zeros((out_ch,), jnp.float32),
        "w2": jax.random.normal(kw2, (3, 3, out_ch, out_ch), jnp.float32) * 0.1,
        "b2": jax.random.normal(kb2, (out_ch,), jnp.float32) * 0.1,
        "g2": jnp.ones((out_ch,), jnp.float32),
        "be2": jnp.zeros((out_ch,), jnp.float32),
    }

    y = jax.block_until_ready(down_forward(x, params))
    assert y.shape == (N, out_ch, H // 2, W // 2), y.shape

    y_ref = jax.block_until_ready(_ref_down(x, params))
    assert jnp.allclose(y, y_ref, rtol=1e-4, atol=1e-4), "mismatch vs JAX reference"

    print("KERNEL_OK")
</pallas_src>

<mosaic_0001>
module attributes {stable_mosaic.version = 11 : i64} {
  func.func @_maxpool_kernel(%arg0: i32, %arg1: memref<1x16x8x8xf32, #tpu.memory_space<vmem>>, %arg2: memref<1x8x8x4xf32, #tpu.memory_space<vmem>>) attributes {dimension_semantics = [#tpu.dimension_semantics<parallel>], iteration_bounds = array<i64: 2>, scalar_prefetch = 0 : i64, scratch_operands = 0 : i64, tpu.core_type = #tpu.core_type<tc>, window_params = [{transform_indices = @transform_0, window_bounds = array<i64: 1, 16, 8, 8>}, {transform_indices = @transform_1, window_bounds = array<i64: 1, 8, 8, 4>}]} {
    %c0 = arith.constant 0 : index
    %c0_0 = arith.constant 0 : index
    %c0_1 = arith.constant 0 : index
    %c0_2 = arith.constant 0 : index
    %0 = vector.load %arg1[%c0, %c0_0, %c0_1, %c0_2] : memref<1x16x8x8xf32, #tpu.memory_space<vmem>>, vector<1x16x8x8xf32>
    %1 = vector.shape_cast %0 : vector<1x16x8x8xf32> to vector<16x8x8xf32>
    %2 = vector.shape_cast %1 : vector<16x8x8xf32> to vector<8x2x8x8xf32>
    %3 = vector.extract_strided_slice %2 {offsets = [0, 0, 0, 0], sizes = [8, 1, 8, 8], strides = [1, 1, 1, 1]} : vector<8x2x8x8xf32> to vector<8x1x8x8xf32>
    %4 = vector.shape_cast %3 : vector<8x1x8x8xf32> to vector<8x8x8xf32>
    %5 = vector.extract_strided_slice %2 {offsets = [0, 1, 0, 0], sizes = [8, 1, 8, 8], strides = [1, 1, 1, 1]} : vector<8x2x8x8xf32> to vector<8x1x8x8xf32>
    %6 = vector.shape_cast %5 : vector<8x1x8x8xf32> to vector<8x8x8xf32>
    %7 = arith.maximumf %4, %6 : vector<8x8x8xf32>
    %8 = vector.extract_strided_slice %7 {offsets = [0, 0, 0], sizes = [8, 8, 4], strides = [1, 1, 1]} : vector<8x8x8xf32> to vector<8x8x4xf32>
    %9 = vector.extract_strided_slice %7 {offsets = [0, 0, 4], sizes = [8, 8, 4], strides = [1, 1, 1]} : vector<8x8x8xf32> to vector<8x8x4xf32>
    %10 = arith.maximumf %8, %9 : vector<8x8x4xf32>
    %c0_3 = arith.constant 0 : index
    %c0_4 = arith.constant 0 : index
    %c0_5 = arith.constant 0 : index
    %c0_6 = arith.constant 0 : index
    %11 = vector.load %arg2[%c0_3, %c0_4, %c0_5, %c0_6] : memref<1x8x8x4xf32, #tpu.memory_space<vmem>>, vector<1x8x8x4xf32>
    %12 = vector.shape_cast %11 : vector<1x8x8x4xf32> to vector<8x8x4xf32>
    %13 = vector.shape_cast %10 : vector<8x8x4xf32> to vector<1x8x8x4xf32>
    tpu.vector_store %arg2[%c0_3, %c0_4, %c0_5, %c0_6], %13 {strides = array<i32>} : memref<1x8x8x4xf32, #tpu.memory_space<vmem>>, vector<1x8x8x4xf32>,
    return
  }
  func.func @transform_0(%arg0: i32) -> (i32, i32, i32, i32) {
    %c0_i32 = arith.constant 0 : i32
    %c0_i32_0 = arith.constant 0 : i32
    %c0_i32_1 = arith.constant 0 : i32
    %c0_i32_2 = arith.constant 0 : i32
    return %arg0, %c0_i32, %c0_i32_0, %c0_i32_1 : i32, i32, i32, i32
  }
  func.func @transform_1(%arg0: i32) -> (i32, i32, i32, i32) {
    %c0_i32 = arith.constant 0 : i32
    %c0_i32_0 = arith.constant 0 : i32
    %c0_i32_1 = arith.constant 0 : i32
    %c0_i32_2 = arith.constant 0 : i32
    return %arg0, %c0_i32, %c0_i32_0, %c0_i32_1 : i32, i32, i32, i32
  }
}

</mosaic_0001>

<bundles_post_ra>
// kernel: tpu_custom_call.1
= control target key start
LH: loop header
LB: loop body
LE: loop exit
PB: predicated region body
PF: predicated region fallthrough
CT: control target
= control target key end

     0   :  { %s286_s6 = smov 0   ;;  %s315_s0 = inlined_call_operand.vmem [shape: f32[2,16,8,8], index: 0, kind: input, shape index: {}]   ;;  %s316_s1 = inlined_call_operand.vmem [shape: f32[2,8,8,4], index: 1, kind: output, shape index: {}]  }
   0x1 LB: > { %s245_s7 = sadd.s32 4294967295, %s273_s6   ;;  %p249_p0 = scmp.ge.s32.totalorder %s273_s6, 1  ;;  %s273_s6 = sphi %s286_s6, %s11_s6  }
   0x2   : > { %p87_p1 = scmp.lt.s32.totalorder %s273_s6, 3 }
   0x4   : > { %p88_p2 = pnand %p249_p0, %p87_p1 }
   0x5   : > { %p107_p3 = scmp.lt.s32.totalorder (!%p88_p2), %s245_s7, 1  ;;  %s275_s12 = smov (!%p88_p2), 124  }
   0x6   : > { %91 = sbr.rel (%p88_p2) target bundleno = 152 (0x98), region = 24 }
   0xb   : > { %s318_s7 = smov (!%p107_p3, %s245_s7), 1  ;;  %vm181_vm0 = vcmask 31744  }
   0xc   : > { %s256_s8 = sshll.u32 %s318_s7, 7  ;;  %s257_s13 = sshll.u32 %s318_s7, 6 }
   0xd   : > { %s111_s11 = scalar_lea.vmem %s315_s0, %s256_s8  ;;  %s116_s16 = scalar_lea.vmem %s316_s1, %s257_s13 }
   0xe   : > { %v121_v0 = vld [vmem:[%s111_s11 + $0x20] sm:$0xff]  ;;  %v122_v1 = vld [vmem:[%s111_s11 + $0x28] sm:$0xff]  ;;  %v123_v6 = vld [vmem:[%s111_s11 + $0x30] sm:$0xff] }
   0xf   : > { %v117_v2 = vld [vmem:[%s111_s11] sm:$0xff]  ;;  %v135_v3 = vmax.f32 %v121_v0, %v122_v1  ;;  %v118_v4 = vld [vmem:[%s111_s11 + $0x8] sm:$0xff]  ;;  %v124_v7 = vld [vmem:[%s111_s11 + $0x38] sm:$0xff] }
  0x10   : > { %v133_v5 = vmax.f32 %v117_v2, %v118_v4  ;;  %v125_v8 = vld [vmem:[%s111_s11 + $0x40] sm:$0xff]  ;;  %v126_v9 = vld [vmem:[%s111_s11 + $0x48] sm:$0xff]  ;;  %v119_v10 = vld [vmem:[%s111_s11 + $0x10] sm:$0xff]  ;;  %v136_v13 = vmax.f32 %v123_v6, %v124_v7 }
  0x11   : > { %153 = vrot.lane.b32.xlu1 %v135_v3, %s275_s12  ;;  %v120_v11 = vld [vmem:[%s111_s11 + $0x18] sm:$0xff]  ;;  %v137_v12 = vmax.f32 %v125_v8, %v126_v9  ;;  %v127_v15 = vld [vmem:[%s111_s11 + $0x50] sm:$0xff]  ;;  %v129_v20 = vld [vmem:[%s111_s11 + $0x60] sm:$0xff] }
  0x12   : > { %149 = vrot.lane.b32.xlu0 %v133_v5, %s275_s12  ;;  %v134_v14 = vmax.f32 %v119_v10, %v120_v11  ;;  %v128_v16 = vld [vmem:[%s111_s11 + $0x58] sm:$0xff]  ;;  %v131_v18 = vld [vmem:[%s111_s11 + $0x70] sm:$0xff]  ;;  %v130_v21 = vld [vmem:[%s111_s11 + $0x68] sm:$0xff] }
  0x13   : > { %157 = vrot.lane.b32.xlu2 %v137_v12, %s275_s12  ;;  %v138_v17 = vmax.f32 %v127_v15, %v128_v16  ;;  %v132_v19 = vld [vmem:[%s111_s11 + $0x78] sm:$0xff]  ;;  %v139_v23 = vmax.f32 %v129_v20, %v130_v21 }
  0x14   : > { %v140_v22 = vmax.f32 %v131_v18, %v132_v19 }
  0x19   : > { %155 = vrot.lane.b32.xlu1 %v136_v13, %s275_s12 }
  0x1a   : > { %151 = vrot.lane.b32.xlu0 %v134_v14, %s275_s12 }
  0x1b   : > { %159 = vrot.lane.b32.xlu2 %v138_v17, %s275_s12 }
  0x21   : > { %163 = vrot.lane.b32.xlu1 %v140_v22, %s275_s12 }
  0x22   : > { %161 = vrot.lane.b32.xlu0 %v139_v23, %s275_s12 }
  0x6d   : > { %v158_v24 = vpop.permute.xlu2 %157 }
  0x6e   : > { %v177_v25 = vmax.f32 %v137_v12, %v158_v24 }
  0x70   : > { %186 = vst.msk [vmem:[%s116_s16 + $0x20] sm:$0xff] %vm181_vm0, %v177_v25 }
  0x75   : > { %v160_v26 = vpop.permute.xlu2 %159 }
  0x76   : > { %v178_v27 = vmax.f32 %v138_v17, %v160_v26 }
  0x78   : > { %187 = vst.msk [vmem:[%s116_s16 + $0x28] sm:$0xff] %vm181_vm0, %v178_v27 }
  0x83   : > { %v154_v28 = vpop.permute.xlu1 %153 }
  0x84   : > { %v175_v29 = vmax.f32 %v135_v3, %v154_v28  ;;  %v150_v30 = vpop.permute.xlu0 %149 }
  0x85   : > { %v173_v31 = vmax.f32 %v133_v5, %v150_v30 }
  0x86   : > { %184 = vst.msk [vmem:[%s116_s16 + $0x10] sm:$0xff] %vm181_vm0, %v175_v29 }
  0x87   : > { %182 = vst.msk [vmem:[%s116_s16] sm:$0xff] %vm181_vm0, %v173_v31 }
  0x8b   : > { %v156_v32 = vpop.permute.xlu1 %155 }
  0x8c   : > { %v176_v33 = vmax.f32 %v136_v13, %v156_v32  ;;  %v152_v34 = vpop.permute.xlu0 %151 }
  0x8d   : > { %v174_v35 = vmax.f32 %v134_v14, %v152_v34 }
  0x8e   : > { %185 = vst.msk [vmem:[%s116_s16 + $0x18] sm:$0xff] %vm181_vm0, %v176_v33 }
  0x8f   : > { %183 = vst.msk [vmem:[%s116_s16 + $0x8] sm:$0xff] %vm181_vm0, %v174_v35 }
  0x93   : > { %v164_v36 = vpop.permute.xlu1 %163 }
  0x94   : > { %v180_v37 = vmax.f32 %v140_v22, %v164_v36  ;;  %v162_v38 = vpop.permute.xlu0 %161 }
  0x95   : > { %v179_v39 = vmax.f32 %v139_v23, %v162_v38 }
  0x96   : > { %189 = vst.msk [vmem:[%s116_s16 + $0x38] sm:$0xff] %vm181_vm0, %v180_v37 }
  0x97   : > { %188 = vst.msk [vmem:[%s116_s16 + $0x30] sm:$0xff] %vm181_vm0, %v179_v39 }
  0x98 PF: > { %s11_s6 = sadd.s32 1, %s273_s6  }
  0x99   : > { %p8_p4 = scmp.ge.s32.totalorder %s11_s6, 4  }
  0x9b   :  { %10 = sbr.rel (!%p8_p4) target bundleno = 1 (0x1), region = 54 }

</bundles_post_ra>
